<compile_context>
chip_gen: v7x
topology: tpu7x:2x2x1
jax: 0.10.0
libtpu: 0.0.40
codegen_flags: <defaults>
</compile_context>

<pallas_src>
import functools

import jax
import jax.numpy as jnp
from jax.experimental import pallas as pl
from jax.experimental.pallas import tpu as pltpu

# ---------------------------- problem sizes ----------------------------
B = 256         # batch of parameter vectors (multiple of 128 -> lane-dense)
D_MODEL = 6     # sed_model.input_size
N_ERR = 2       # error_func.n_params
HID = 32        # hidden width of the synthetic SED emulator
NB = 16         # number of photometric bands

SIGN = 1.0            # configure_output_mode(negative=False)
LOG_OUT = -1.0e15     # configure_output_mode(log_out=-1e15)
LOG_2PI = float(jnp.log(2.0 * jnp.pi))

# Feature-major param block layout: rows = [p_model(6) ; ones(1) ; p_error(2)]
P_ROWS = D_MODEL + 1 + N_ERR        # 9
PE0_ROW = D_MODEL + 1               # 7
PE1_ROW = D_MODEL + 2               # 8

# Packed constants block layout (all sub-arrays at lane offset 0,
# sublane offsets multiples of 8 -> clean aligned loads, single DMA stream).
R_W1 = 0                            # [HID, D_MODEL+1]  augmented layer-1 weights
R_W2 = R_W1 + HID                   # [NB, HID]         pre-scaled layer-2 weights
R_C = R_W2 + NB                     # [NB, 1]           c' = (b2 - y_obs)/sigma_obs
R_IS = R_C + NB                     # [NB, 1]           1/sigma_obs column
R_LB = R_IS + NB                    # [P_ROWS, 1]       lower bounds
R_UB = R_LB + 16                    # [P_ROWS, 1]       upper bounds
C_ROWS = R_UB + 16                  # 112  (multiple of 8)
C_COLS = HID                        # 32


# ------------------------------ kernel ---------------------------------
def _posterior_kernel(s_ref, params_ref, consts_ref, out_ref, *, sign, log_out):
    # params tile, feature-major: [P_ROWS, TB] = [pm(6); ones(1); pe(2)]
    p = params_ref[...]
    pm_aug = p[: D_MODEL + 1, :]                      # [7, TB] (bias row folded)
    pe0 = p[PE0_ROW:PE0_ROW + 1, :]                   # [1, TB] log-sigma shift
    pe1 = p[PE1_ROW:PE1_ROW + 1, :]                   # [1, TB] additive offset

    # constants: static, aligned slices of the single packed VMEM block
    w1aug = consts_ref[R_W1:R_W1 + HID, : D_MODEL + 1]   # [HID, 7] = [W1^T | b1^T]
    w2s = consts_ref[R_W2:R_W2 + NB, :HID]               # [NB, HID] diag(1/sig)@W2^T
    c_col = consts_ref[R_C:R_C + NB, 0:1]                # [NB, 1]
    is_col = consts_ref[R_IS:R_IS + NB, 0:1]             # [NB, 1]  1/sigma_obs
    lb = consts_ref[R_LB:R_LB + P_ROWS, 0:1]             # [P_ROWS, 1]
    ub = consts_ref[R_UB:R_UB + P_ROWS, 0:1]             # [P_ROWS, 1]

    # combined bounds check (model + error params; ones row has dummy bounds)
    is_out = jnp.any((p < lb) | (p > ub), axis=0, keepdims=True)     # [1, TB]

    # --- SED emulator MLP on the MXU, biases folded into the contractions ---
    h = jnp.maximum(
        jnp.dot(w1aug, pm_aug, preferred_element_type=jnp.float32), 0.0)  # [HID,TB]
    z = jnp.dot(w2s, h, preferred_element_type=jnp.float32)               # [NB, TB]

    # pre-scaled residual (the exp(-pe0) factor is deferred to one [1,TB] scale)
    r = z + c_col + is_col * pe1                                           # [NB, TB]
    q = jnp.sum(r * r, axis=0, keepdims=True)                              # [1, TB]

    # Gaussian log-likelihood: sum(2*log(sigma)+log2pi) = S + 2*NB*pe0
    s = s_ref[0, 0]                                                        # SMEM scalar
    log_like = -0.5 * (jnp.exp(-2.0 * pe0) * q + s + (2.0 * NB) * pe0)     # [1, TB]

    # log_post = sign * (logL + log_out * is_out), lane-dense [1, TB]
    out_ref[...] = sign * (log_like + log_out * is_out.astype(jnp.float32))


# --------------------------- one-time packing ----------------------------
def pack_posterior_constants(weights):
    """Pack model weights / bounds / obs data ONCE into (consts, s_smem)."""
    (w1, b1, w2, b2, lb_m, ub_m, lb_e, ub_e, y_obs, sigma_obs) = weights
    inv_sig = 1.0 / sigma_obs                                   # [1, NB]

    w1aug = jnp.concatenate([w1.T, b1.T], axis=1)               # [HID, D+1]
    w2s = inv_sig.T * w2.T                                      # [NB, HID]
    c_col = ((b2 - y_obs) * inv_sig).T                          # [NB, 1]
    is_col = inv_sig.T                                          # [NB, 1]

    # bounds for the 9 feature-major rows; the ones row can never be out.
    lb = jnp.concatenate([lb_m[0], jnp.array([0.0], jnp.float32), lb_e[0]])[:, None]
    ub = jnp.concatenate([ub_m[0], jnp.array([2.0], jnp.float32), ub_e[0]])[:, None]

    consts = jnp.zeros((C_ROWS, C_COLS), jnp.float32)
    consts = consts.at[R_W1:R_W1 + HID, : D_MODEL + 1].set(w1aug)
    consts = consts.at[R_W2:R_W2 + NB, :HID].set(w2s)
    consts = consts.at[R_C:R_C + NB, 0:1].set(c_col)
    consts = consts.at[R_IS:R_IS + NB, 0:1].set(is_col)
    consts = consts.at[R_LB:R_LB + P_ROWS, 0:1].set(lb)
    consts = consts.at[R_UB:R_UB + P_ROWS, 0:1].set(ub)

    s_const = jnp.sum(2.0 * jnp.log(sigma_obs)) + NB * LOG_2PI  # scalar S
    s_smem = jnp.reshape(s_const.astype(jnp.float32), (1, 1))
    return consts, s_smem


# ------------------------------ forward ----------------------------------
def posterior_forward(params, consts, s_smem):
    """params: [B, D_MODEL + N_ERR] float32 -> log_post: [B] float32.

    Jit this function; `consts`/`s_smem` come from pack_posterior_constants.
    """
    params = jnp.atleast_2d(params).astype(jnp.float32)
    b = params.shape[0]

    # feature-major augmented params: [pm ; ones ; pe] -> [P_ROWS, b]
    pm = params[:, :D_MODEL]
    pe = params[:, D_MODEL:]
    ones = jnp.ones((b, 1), jnp.float32)
    p_aug_t = jnp.concatenate([pm, ones, pe], axis=1).T         # [P_ROWS, b]

    # Batch tiling only for very large B (v7x dual-TC / pipelining); otherwise
    # a single grid step keeps fixed overhead minimal (review items 1 & 7).
    if b >= 2048 and b % 1024 == 0:
        tb = 1024
    else:
        tb = b
    grid = (b // tb,)

    kernel = functools.partial(_posterior_kernel, sign=SIGN, log_out=LOG_OUT)
    out = pl.pallas_call(
        kernel,
        out_shape=jax.ShapeDtypeStruct((1, b), jnp.float32),
        grid=grid,
        in_specs=[
            pl.BlockSpec(memory_space=pltpu.MemorySpace.SMEM),       # scalar S
            pl.BlockSpec((P_ROWS, tb), lambda i: (0, i)),            # params tile
            pl.BlockSpec((C_ROWS, C_COLS), lambda i: (0, 0)),        # constants (VMEM-resident)
        ],
        out_specs=pl.BlockSpec((1, tb), lambda i: (0, i)),
        compiler_params=pltpu.CompilerParams(
            dimension_semantics=("parallel",)),
    )(s_smem, p_aug_t, consts)
    return out[0]                                                    # [B]


# --------------------------- pure-JAX reference --------------------------
def posterior_reference(params, weights):
    (w1, b1, w2, b2, lb_m, ub_m, lb_e, ub_e, y_obs, sigma_obs) = weights
    params = jnp.atleast_2d(params).astype(jnp.float32)
    pm = params[:, :D_MODEL]
    pe = params[:, D_MODEL:]
    h = jnp.maximum(pm @ w1 + b1, 0.0)
    y_pred = h @ w2 + b2
    is_out = jnp.any((pm < lb_m) | (pm > ub_m), axis=-1, keepdims=True)
    is_out |= jnp.any((pe < lb_e) | (pe > ub_e), axis=-1, keepdims=True)
    sigma = sigma_obs * jnp.exp(pe[:, 0:1])
    resid = (y_pred + pe[:, 1:2] - y_obs) / sigma
    log_like = -0.5 * jnp.sum(resid * resid + 2.0 * jnp.log(sigma) + LOG_2PI,
                              axis=-1, keepdims=True)
    return (SIGN * (log_like + LOG_OUT * is_out.astype(jnp.float32)))[:, 0]


# --------------------------- deterministic init ---------------------------
def make_weights(key):
    ks = jax.random.split(key, 6)
    w1 = jax.random.normal(ks[0], (D_MODEL, HID), jnp.float32) / jnp.sqrt(D_MODEL)
    b1 = jnp.zeros((1, HID), jnp.float32)
    w2 = jax.random.normal(ks[1], (HID, NB), jnp.float32) / jnp.sqrt(HID)
    b2 = jnp.zeros((1, NB), jnp.float32)
    lb_m = -3.0 * jnp.ones((1, D_MODEL), jnp.float32)
    ub_m = 3.0 * jnp.ones((1, D_MODEL), jnp.float32)
    lb_e = jnp.array([[-2.0, -1.0]], jnp.float32)
    ub_e = jnp.array([[2.0, 1.0]], jnp.float32)
    y_obs = jax.random.normal(ks[2], (1, NB), jnp.float32)
    sigma_obs = 0.1 + jax.nn.softplus(
        jax.random.normal(ks[3], (1, NB), jnp.float32))
    return (w1, b1, w2, b2, lb_m, ub_m, lb_e, ub_e, y_obs, sigma_obs)


if __name__ == "__main__":
    key = jax.random.PRNGKey(0)
    k_params, k_weights = jax.random.split(key)
    weights = make_weights(k_weights)

    # one-time packing (hot path only transposes/augments the params)
    consts, s_smem = pack_posterior_constants(weights)

    # parameter vectors: [B, D_MODEL + N_ERR]; make a couple out of bounds
    params = jax.random.normal(k_params, (B, D_MODEL + N_ERR), jnp.float32)
    params = params.at[3, 0].set(10.0)           # violates model bounds
    params = params.at[7, D_MODEL + 1].set(5.0)  # violates error-func bounds

    forward = jax.jit(posterior_forward)
    log_post = jax.block_until_ready(forward(params, consts, s_smem))

    ref = posterior_reference(params, weights)
    if not jnp.allclose(log_post, ref, rtol=1e-4, atol=1e-4):
        raise AssertionError("Pallas kernel mismatch vs reference")

    print("KERNEL_OK")
</pallas_src>

<mosaic_0001>
module attributes {stable_mosaic.version = 11 : i64} {
  func.func @_posterior_kernel(%arg0: i32, %arg1: memref<1x1xf32, #tpu.memory_space<smem>>, %arg2: memref<9x256xf32, #tpu.memory_space<vmem>>, %arg3: memref<112x32xf32, #tpu.memory_space<vmem>>, %arg4: memref<1x256xf32, #tpu.memory_space<vmem>>) attributes {dimension_semantics = [#tpu.dimension_semantics<parallel>], iteration_bounds = array<i64: 1>, scalar_prefetch = 0 : i64, scratch_operands = 0 : i64, tpu.core_type = #tpu.core_type<tc>, window_params = [{transform_indices = @transform_0, window_bounds = array<i64: 1, 1>}, {transform_indices = @transform_1, window_bounds = array<i64: 9, 256>}, {pipeline_mode = #tpu.pipeline_mode<synchronous>, transform_indices = @transform_2, window_bounds = array<i64: 112, 32>}, {transform_indices = @transform_3, window_bounds = array<i64: 1, 256>}]} {
    %c0 = arith.constant 0 : index
    %c0_0 = arith.constant 0 : index
    %0 = vector.load %arg2[%c0, %c0_0] : memref<9x256xf32, #tpu.memory_space<vmem>>, vector<9x256xf32>
    %1 = vector.extract_strided_slice %0 {offsets = [0, 0], sizes = [7, 256], strides = [1, 1]} : vector<9x256xf32> to vector<7x256xf32>
    %2 = vector.extract_strided_slice %0 {offsets = [7, 0], sizes = [1, 256], strides = [1, 1]} : vector<9x256xf32> to vector<1x256xf32>
    %3 = vector.extract_strided_slice %0 {offsets = [8, 0], sizes = [1, 256], strides = [1, 1]} : vector<9x256xf32> to vector<1x256xf32>
    %c0_1 = arith.constant 0 : index
    %c0_2 = arith.constant 0 : index
    %4 = vector.load %arg3[%c0_1, %c0_2] : memref<112x32xf32, #tpu.memory_space<vmem>>, vector<32x7xf32>
    %c32 = arith.constant 32 : index
    %c0_3 = arith.constant 0 : index
    %5 = vector.load %arg3[%c32, %c0_3] : memref<112x32xf32, #tpu.memory_space<vmem>>, vector<16x32xf32>
    %c48 = arith.constant 48 : index
    %c0_4 = arith.constant 0 : index
    %6 = vector.load %arg3[%c48, %c0_4] : memref<112x32xf32, #tpu.memory_space<vmem>>, vector<16x1xf32>
    %c64 = arith.constant 64 : index
    %c0_5 = arith.constant 0 : index
    %7 = vector.load %arg3[%c64, %c0_5] : memref<112x32xf32, #tpu.memory_space<vmem>>, vector<16x1xf32>
    %c80 = arith.constant 80 : index
    %c0_6 = arith.constant 0 : index
    %8 = vector.load %arg3[%c80, %c0_6] : memref<112x32xf32, #tpu.memory_space<vmem>>, vector<9x1xf32>
    %c96 = arith.constant 96 : index
    %c0_7 = arith.constant 0 : index
    %9 = vector.load %arg3[%c96, %c0_7] : memref<112x32xf32, #tpu.memory_space<vmem>>, vector<9x1xf32>
    %10 = vector.broadcast %8 : vector<9x1xf32> to vector<9x256xf32>
    %11 = arith.cmpf olt, %0, %10 : vector<9x256xf32>
    %12 = vector.broadcast %9 : vector<9x1xf32> to vector<9x256xf32>
    %13 = arith.cmpf ogt, %0, %12 : vector<9x256xf32>
    %14 = arith.ori %11, %13 : vector<9x256xi1>
    %cst = arith.constant 1.000000e+00 : f32
    %cst_8 = arith.constant 0.000000e+00 : f32
    %15 = vector.broadcast %cst : f32 to vector<9x256xf32>
    %16 = vector.broadcast %cst_8 : f32 to vector<9x256xf32>
    %17 = arith.select %14, %15, %16 : vector<9x256xi1>, vector<9x256xf32>
    %cst_9 = arith.constant dense<0xFF800000> : vector<256xf32>
    %18 = vector.multi_reduction <maximumf>, %17, %cst_9 [0] : vector<9x256xf32> to vector<256xf32>
    %cst_10 = arith.constant 0.000000e+00 : f32
    %19 = vector.broadcast %cst_10 : f32 to vector<256xf32>
    %20 = arith.cmpf ogt, %18, %19 : vector<256xf32>
    %21 = vector.shape_cast %20 : vector<256xi1> to vector<1x256xi1>
    %cst_11 = arith.constant dense<0.000000e+00> : vector<32x256xf32>
    %22 = tpu.matmul %4, %1, %cst_11 {dimension_numbers = #tpu.dot_dimension_numbers<[1], [0], [0], [1], [0, 0, 1, 1], [], []>} : vector<32x7xf32>, vector<7x256xf32>, vector<32x256xf32> -> vector<32x256xf32>
    %cst_12 = arith.constant 0.000000e+00 : f32
    %23 = vector.broadcast %cst_12 : f32 to vector<32x256xf32>
    %24 = arith.maximumf %22, %23 : vector<32x256xf32>
    %cst_13 = arith.constant dense<0.000000e+00> : vector<16x256xf32>
    %25 = tpu.matmul %5, %24, %cst_13 {dimension_numbers = #tpu.dot_dimension_numbers<[1], [0], [0], [1], [0, 0, 1, 1], [], []>} : vector<16x32xf32>, vector<32x256xf32>, vector<16x256xf32> -> vector<16x256xf32>
    %26 = vector.broadcast %6 : vector<16x1xf32> to vector<16x256xf32>
    %27 = arith.addf %25, %26 : vector<16x256xf32>
    %28 = vector.broadcast %7 : vector<16x1xf32> to vector<16x256xf32>
    %29 = vector.broadcast %3 : vector<1x256xf32> to vector<16x256xf32>
    %30 = arith.mulf %28, %29 : vector<16x256xf32>
    %31 = arith.addf %27, %30 : vector<16x256xf32>
    %32 = arith.mulf %31, %31 : vector<16x256xf32>
    %cst_14 = arith.constant dense<0.000000e+00> : vector<256xf32>
    %33 = vector.multi_reduction <add>, %32, %cst_14 [0] : vector<16x256xf32> to vector<256xf32>
    %34 = vector.shape_cast %33 : vector<256xf32> to vector<1x256xf32>
    %c0_15 = arith.constant 0 : index
    %c0_16 = arith.constant 0 : index
    %35 = memref.load %arg1[%c0_15, %c0_16] : memref<1x1xf32, #tpu.memory_space<smem>>
    %cst_17 = arith.constant -2.000000e+00 : f32
    %36 = vector.broadcast %cst_17 : f32 to vector<1x256xf32>
    %37 = arith.mulf %36, %2 : vector<1x256xf32>
    %38 = math.exp %37 : vector<1x256xf32>
    %39 = arith.mulf %38, %34 : vector<1x256xf32>
    %40 = vector.broadcast %35 : f32 to vector<1x256xf32>
    %41 = arith.addf %39, %40 : vector<1x256xf32>
    %cst_18 = arith.constant 3.200000e+01 : f32
    %42 = vector.broadcast %cst_18 : f32 to vector<1x256xf32>
    %43 = arith.mulf %42, %2 : vector<1x256xf32>
    %44 = arith.addf %41, %43 : vector<1x256xf32>
    %cst_19 = arith.constant -5.000000e-01 : f32
    %45 = vector.broadcast %cst_19 : f32 to vector<1x256xf32>
    %46 = arith.mulf %45, %44 : vector<1x256xf32>
    %47 = arith.extui %21 : vector<1x256xi1> to vector<1x256xi32>
    %48 = arith.sitofp %47 : vector<1x256xi32> to vector<1x256xf32>
    %cst_20 = arith.constant -9.99999986E+14 : f32
    %49 = vector.broadcast %cst_20 : f32 to vector<1x256xf32>
    %50 = arith.mulf %49, %48 : vector<1x256xf32>
    %51 = arith.addf %46, %50 : vector<1x256xf32>
    %cst_21 = arith.constant 1.000000e+00 : f32
    %52 = vector.broadcast %cst_21 : f32 to vector<1x256xf32>
    %53 = arith.mulf %52, %51 : vector<1x256xf32>
    %c0_22 = arith.constant 0 : index
    %c0_23 = arith.constant 0 : index
    %54 = vector.load %arg4[%c0_22, %c0_23] : memref<1x256xf32, #tpu.memory_space<vmem>>, vector<1x256xf32>
    tpu.vector_store %arg4[%c0_22, %c0_23], %53 {strides = array<i32>} : memref<1x256xf32, #tpu.memory_space<vmem>>, vector<1x256xf32>,
    return
  }
  func.func @transform_0(%arg0: i32) -> (i32, i32) {
    %c0_i32 = arith.constant 0 : i32
    %c0_i32_0 = arith.constant 0 : i32
    %c0_i32_1 = arith.constant 0 : i32
    return %c0_i32, %c0_i32_0 : i32, i32
  }
  func.func @transform_1(%arg0: i32) -> (i32, i32) {
    %c0_i32 = arith.constant 0 : i32
    %c0_i32_0 = arith.constant 0 : i32
    return %c0_i32, %arg0 : i32, i32
  }
  func.func @transform_2(%arg0: i32) -> (i32, i32) {
    %c0_i32 = arith.constant 0 : i32
    %c0_i32_0 = arith.constant 0 : i32
    %c0_i32_1 = arith.constant 0 : i32
    return %c0_i32, %c0_i32_0 : i32, i32
  }
  func.func @transform_3(%arg0: i32) -> (i32, i32) {
    %c0_i32 = arith.constant 0 : i32
    %c0_i32_0 = arith.constant 0 : i32
    return %c0_i32, %arg0 : i32, i32
  }
}

</mosaic_0001>

<bundles_post_ra>
// kernel: posterior_forward.1
= control target key start
LH: loop header
LB: loop body
LE: loop exit
PB: predicated region body
PF: predicated region fallthrough
CT: control target
= control target key end

     0   :  { %vm102_vm0 = vcmask 1046528   ;;  %vm89_vm1 = vcmask 56320   ;;  %v461_v3 = vmov 0.0   ;;  %s590_s0 = inlined_call_operand.<no memory space> [shape: f32[1,1], index: 0, kind: input, shape index: {}]   ;;  %s591_s1 = inlined_call_operand.vmem [shape: f32[9,256], index: 1, kind: input, shape index: {}]   ;;  %s592_s2 = inlined_call_operand.vmem [shape: f32[112,32], index: 2, kind: input, shape index: {}]   ;;  %s593_s3 = inlined_call_operand.hbm [shape: f32[1,256], index: 3, kind: output, shape index: {}]  }
   0x1   :  { %v488_v0 = vld [vmem:[%s591_s1 + $0x8] sm:$0xff]  ;;  %v493_v1 = vld [vmem:[%s591_s1] sm:$0xff]  ;;  %173 = vmatprep.mubr.f32.mxu0 %v461_v3  ;;  %287 = vmatprep.mubr.f32.mxu1 %v461_v3 }
   0x2   :  { %v20_v2 = vld [vmem:[%s592_s2] sm:$0xff]  ;;  %409 = vmatprep.subr.msk.mxu0 %vm102_vm0, %v488_v0 }
   0x3   :  { %410 = vmatpush1.msk.msra.mxu0 %vm102_vm0, %v493_v1 }
   0x4   :  { %9 = vsyncpa [#allocation4], 0  ;;  %411 = vmatmul.mubr.msk.f32.vlgmr.msra.gmra.mrb[0].mxu0 %vm89_vm1, %v20_v2  ;;  %v21_v4 = vld [vmem:[%s592_s2 + $0x8] sm:$0xff]  ;;  %v22_v5 = vld [vmem:[%s592_s2 + $0x10] sm:$0xff]  ;;  %v462_v9 = vmov 0   ;;  %vm216_vm2 = vcmask 261120   ;;  %v310_v46 = vlaneseq }
   0x5   :  { %179 = vmatprep.mubr.f32.mxu0 %v461_v3  ;;  %v23_v6 = vld [vmem:[%s592_s2 + $0x18] sm:$0xff]  ;;  %v28_v7 = vld [vmem:[%s592_s2 + $0x40] sm:$0xff]  ;;  %v26_v8 = vld [vmem:[%s592_s2 + $0x30] sm:$0xff]  ;;  %432 = vset.pattern.permute.xlu1 %v462_v9  ;;  %vm70_vm13 = vcmask 1040384  }
   0x6   :  { %431 = vset.pattern.permute.xlu0 %v462_v9  ;;  %302 = vperm.xlu1 %432, %v28_v7   ;;  %v29_v10 = vld [vmem:[%s592_s2 + $0x48] sm:$0xff]  ;;  %v27_v11 = vld [vmem:[%s592_s2 + $0x38] sm:$0xff]  ;;  %v32_v14 = vld [vmem:[%s592_s2 + $0x60] sm:$0xff]  ;;  %v558_v49 = vshrl.u32 %v310_v46, 7  ;;  %v345_v9 = vmul.f32 -2.0, %v493_v1 }
   0x7   :  { %208 = vperm.xlu0 %431, %v26_v8   ;;  %v33_v12 = vld [vmem:[%s592_s2 + $0x68] sm:$0x1]  ;;  %v31_v13 = vld [vmem:[%s592_s2 + $0x58] sm:$0x1]  ;;  %v30_v15 = vld [vmem:[%s592_s2 + $0x50] sm:$0xff]  ;;  %v346_v8 = vmul.f32 -2.0, %v488_v0 }
   0x8   :  { %412 = vmatmul.mubr.msk.f32.gmra.mrb[2].mxu0 %vm89_vm1, %v21_v4  ;;  %v24_v36 = vld [vmem:[%s592_s2 + $0x20] sm:$0xff]  ;;  %v25_v37 = vld [vmem:[%s592_s2 + $0x28] sm:$0xff]  ;;  %v18_v44 = vld [vmem:[%s591_s1 + $0x10] sm:$0x1]  ;;  %v312_v52 = vsub.s32 0, %v558_v49 }
   0x9   :  { %185 = vmatprep.mubr.f32.mxu0 %v461_v3  ;;  %v19_v45 = vld [vmem:[%s591_s1 + $0x18] sm:$0x1] }
   0xa   :  { %307 = vperm.xlu1 %432, %v29_v10   ;;  %v313_v57 = vrot.slane %v18_v44, %v312_v52  ;;  %v317_v59 = vrot.slane %v19_v45, %v312_v52 }
   0xb   :  { %213 = vperm.xlu0 %431, %v27_v11  }
   0xc   :  { %413 = vmatmul.mubr.msk.f32.gmra.mrb[4].mxu0 %vm89_vm1, %v22_v5 }
   0xd   :  { %191 = vmatprep.mubr.f32.mxu0 %v461_v3 }
   0xe   :  { %55 = vperm.xlu1 %432, %v33_v12  }
   0xf   :  { %41 = vperm.xlu0 %431, %v31_v13  }
  0x10   :  { %414 = vmatmul.mubr.msk.f32.gmra.mrb[6].mxu0 %vm89_vm1, %v23_v6 }
  0x12   :  { %50 = vperm.xlu1 %432, %v32_v14  }
  0x13   :  { %36 = vperm.xlu0 %431, %v30_v15  }
  0x85   :  { %v303_v38 = vpop.permute.xlu1 %302 }
  0x86   :  { %v209_v39 = vpop.permute.xlu0 %208  ;;  %v318_v62 = vmul.f32 %v313_v57, %v303_v38  ;;  %v319_v5 = vmul.f32 %v317_v59, %v303_v38 }
  0x89   :  { %v308_v40 = vpop.permute.xlu1 %307 }
  0x8a   :  { %v214_v41 = vpop.permute.xlu0 %213  ;;  %v320_v11 = vmul.f32 %v313_v57, %v308_v40  ;;  %v357_v57 = vmul.f32 32.0, %v488_v0 }
  0x8d   :  { %v56_v42 = vpop.permute.xlu1 %55 }
  0x8e   :  { %v42_v43 = vpop.permute.xlu0 %41  ;;  %vm60_vm3 = vcmp.gt.f32.partialorder %v18_v44, %v56_v42  ;;  %vm61_vm5 = vcmp.gt.f32.partialorder %v19_v45, %v56_v42 }
  0x8f   :  { %vm46_vm4 = vcmp.lt.f32.partialorder %v18_v44, %v42_v43  ;;  %vm47_vm6 = vcmp.lt.f32.partialorder %v19_v45, %v42_v43 }
  0x90   :  { %vm64_vm7 = vmor %vm46_vm4, %vm60_vm3 }
  0x91   :  { %v51_v47 = vpop.permute.xlu1 %50  ;;  %vm65_vm10 = vmor %vm47_vm6, %vm61_vm5  ;;  %v68_v50 = vsel %vm64_vm7, 1.0, %v461_v3 }
  0x92   :  { %v37_v48 = vpop.permute.xlu0 %36  ;;  %vm58_vm8 = vcmp.gt.f32.partialorder %v493_v1, %v51_v47  ;;  %vm59_vm11 = vcmp.gt.f32.partialorder %v488_v0, %v51_v47  ;;  %v69_v51 = vsel %vm65_vm10, 1.0, %v461_v3  ;;  %v71_v54 = vsel %vm70_vm13, %v68_v50, -inf }
  0x93   :  { %vm44_vm9 = vcmp.lt.f32.partialorder %v493_v1, %v37_v48  ;;  %vm45_vm12 = vcmp.lt.f32.partialorder %v488_v0, %v37_v48  ;;  %v79_v56 = vsel %vm70_vm13, %v69_v51, -inf }
  0x94   :  { %vm62_vm14 = vmor %vm44_vm9, %vm58_vm8 }
  0x95   :  { %vm63_vm15 = vmor %vm45_vm12, %vm59_vm11  ;;  %v66_v53 = vsel %vm62_vm14, 1.0, %v461_v3 }
  0x96   :  { %v67_v55 = vsel %vm63_vm15, 1.0, %v461_v3  ;;  %v72_v58 = vmax.f32 %v66_v53, %v71_v54  ;;  %v353_v53 = vstv %s590_s0  ;;  %s464_s0 = smov [#allocation3]  }
  0x97   :  { %v80_v60 = vmax.f32 %v67_v55, %v79_v56  ;;  %v356_v55 = vmul.f32 32.0, %v493_v1  ;;  %s401_s21 = sshll.u32 %s464_s0, 4  ;;  %s402_s21 = int_to_ptr.vmem [resolvable:$true] %s401_s21 }
  0x98   :  { %v73_v63 = vrot.slane %v72_v58, 4  ;;  %s437_s22 = scalar_lea.vmem %s402_s21, 32  ;;  %p442_p1 = scmp.lt.s32.totalorder %s402_s21, %s402_s21 }
  0x99   :  { %v81_v6 = vrot.slane %v80_v60, 4  ;;  %p438_p0 = scmp.ne.s32.totalorder %s402_s21, %s437_s22  ;;  %p443_p2 = scmp.lt.s32.totalorder %s437_s22, %s437_s22 }
  0x9a   :  { %v74_v12 = vmax.f32 %v72_v58, %v73_v63 }
  0x9b   :  { %p444_p3 = por %p443_p2, %p442_p1 }
  0x9d   :  { %p445_p4 = pnand %p444_p3, %p438_p0 }
  0xd7   :  { %v175_v16 = vpop.f32.mrb[0].mxu0 }
  0xd8   :  { %v177_v17 = vpop.f32.mrb[1].mxu0  ;;  %v198_v19 = vmax.f32 %v175_v16, 0.0  ;;  %v321_v16 = vmul.f32 %v317_v59, %v308_v40  ;;  %v463_v59 = vmov 1966171168  }
  0xd9   :  { %v199_v22 = vmax.f32 %v177_v17, 0.0  ;;  %v82_v17 = vmax.f32 %v80_v60, %v81_v6  ;;  %v374_v60 = vunpack.c.l.s4 %v463_v59 }
  0xdb   :  { %v181_v18 = vpop.f32.mrb[2].mxu0  ;;  %v375_v6 = vunpack.c.0.s8 %v374_v60 }
  0xdc   :  { %v200_v20 = vmax.f32 %v181_v18, 0.0  ;;  %v183_v21 = vpop.f32.mrb[3].mxu0 }
  0xdd   :  { %v201_v23 = vmax.f32 %v183_v21, 0.0  ;;  %v347_v21 = vmul.f32 1.442695, %v345_v9  ;;  %v378_v0 = vsub.s32 %v375_v6, %v558_v49 }
  0xde   :  { %v421_v24 = vpack.c.bf16 %v200_v20, %v198_v19 }
  0xdf   :  { %v187_v25 = vpop.f32.mrb[4].mxu0  ;;  %v419_v26 = vpack.c.bf16 %v201_v23, %v199_v22  ;;  %v349_v23 = vmul.f32 1.442695, %v346_v8  ;;  %433 = vpow2.f32 %v347_v21 }
  0xe0   :  { %v189_v27 = vpop.f32.mrb[5].mxu0  ;;  %v202_v29 = vmax.f32 %v187_v25, 0.0 }
  0xe1   :  { %420 = vmatprep.subr.bf16.mxu1 %v419_v26  ;;  %v203_v32 = vmax.f32 %v189_v27, 0.0  ;;  %v83_v27 = vrot.slane %v82_v17, 2  ;;  %435 = vpow2.f32 %v349_v23 }
  0xe2   :  { %422 = vmatpush1.bf16.msra.mxu1 %v421_v24  ;;  %v75_v24 = vrot.slane %v74_v12, 2 }
  0xe3   :  { %v193_v28 = vpop.f32.mrb[6].mxu0 }
  0xe4   :  { %v204_v30 = vmax.f32 %v193_v28, 0.0  ;;  %v195_v31 = vpop.f32.mrb[7].mxu0 }
  0xe5   :  { %v205_v33 = vmax.f32 %v195_v31, 0.0 }
  0xe6   :  { %v425_v34 = vpack.c.bf16 %v204_v30, %v202_v29 }
  0xe7   :  { %v423_v35 = vpack.c.bf16 %v205_v33, %v203_v32  ;;  %v76_v32 = vmax.f32 %v74_v12, %v75_v24 }
  0xe9   :  { %424 = vmatprep.subr.bf16.mxu1 %v423_v35  ;;  %v77_v38 = vrot.slane %v76_v32, 1  ;;  %v434_v47 = vpop.eup %433 }
  0xea   :  { %426 = vmatpush1.bf16.msra.mxu1 %v425_v34  ;;  %v84_v34 = vmax.f32 %v82_v17, %v83_v27 }
  0xeb   :  { %v78_v44 = vmax.f32 %v76_v32, %v77_v38  ;;  %v436_v51 = vpop.eup %435 }
  0xec   :  { %v85_v40 = vrot.slane %v84_v34, 1 }
  0xed   :  { %415 = vmatmul.mubr.msk.f32.vlgmr.msra.gmra.mrb[0].mxu1 %vm216_vm2, %v24_v36  ;;  %vm87_vm0 = vcmp.gt.f32.partialorder %v78_v44, 0.0 }
  0xee   :  { %293 = vmatprep.mubr.f32.mxu1 %v461_v3  ;;  %v86_v48 = vmax.f32 %v84_v34, %v85_v40 }
  0xf0   :  { %vm88_vm1 = vcmp.gt.f32.partialorder %v86_v48, 0.0 }
  0xf1   :  { %416 = vmatmul.mubr.msk.f32.gmra.mrb[2].mxu1 %vm216_vm2, %v25_v37  ;;  %vm392_vm2 = vcmp.lt.s32.totalorder %v310_v46, 256 }
 0x1c0   :  { %v289_v61 = vpop.f32.mrb[0].mxu1 }
 0x1c1   :  { %v290_v2 = vadd.f32 %v289_v61, %v209_v39  ;;  %v291_v4 = vpop.f32.mrb[1].mxu1 }
 0x1c2   :  { %v292_v7 = vadd.f32 %v291_v4, %v209_v39 }
 0x1c3   :  { %v322_v13 = vadd.f32 %v318_v62, %v290_v2  ;;  %v417_v62 = vsel %vm87_vm0, 1.0, %v461_v3  ;;  %v418_v2 = vsel %vm88_vm1, 1.0, %v461_v3 }
 0x1c4   :  { %v295_v10 = vpop.f32.mrb[2].mxu1  ;;  %v323_v18 = vadd.f32 %v319_v5, %v292_v7  ;;  %v366_v7 = vmul.f32 -1e+15, %v417_v62  ;;  %v367_v1 = vmul.f32 -1e+15, %v418_v2 }
 0x1c5   :  { %v296_v14 = vadd.f32 %v295_v10, %v214_v41  ;;  %v297_v15 = vpop.f32.mrb[3].mxu1  ;;  %v326_v25 = vmul.f32 %v322_v13, %v322_v13 }
 0x1c6   :  { %v298_v19 = vadd.f32 %v297_v15, %v214_v41  ;;  %v327_v28 = vmul.f32 %v323_v18, %v323_v18 }
 0x1c7   :  { %v324_v20 = vadd.f32 %v320_v11, %v296_v14 }
 0x1c8   :  { %v325_v22 = vadd.f32 %v321_v16, %v298_v19 }
 0x1c9   :  { %v328_v26 = vmul.f32 %v324_v20, %v324_v20 }
 0x1ca   :  { %v329_v29 = vmul.f32 %v325_v22, %v325_v22 }
 0x1cb   :  { %v330_v30 = vadd.f32 %v328_v26, %v326_v25 }
 0x1cc   :  { %v337_v31 = vadd.f32 %v329_v29, %v327_v28 }
 0x1cd   :  { %v331_v33 = vrot.slane %v330_v30, 4 }
 0x1ce   :  { %v338_v35 = vrot.slane %v337_v31, 4 }
 0x1cf   :  { %v332_v36 = vadd.f32 %v331_v33, %v330_v30 }
 0x1d0   :  { %v339_v37 = vadd.f32 %v338_v35, %v337_v31 }
 0x1d1   :  { %v333_v39 = vrot.slane %v332_v36, 2 }
 0x1d2   :  { %v340_v41 = vrot.slane %v339_v37, 2 }
 0x1d3   :  { %v334_v42 = vadd.f32 %v333_v39, %v332_v36 }
 0x1d4   :  { %v341_v43 = vadd.f32 %v340_v41, %v339_v37 }
 0x1d5   :  { %v335_v45 = vrot.slane %v334_v42, 1 }
 0x1d6   :  { %v342_v50 = vrot.slane %v341_v43, 1 }
 0x1d7   :  { %v336_v52 = vadd.f32 %v335_v45, %v334_v42 }
 0x1d8   :  { %v343_v54 = vadd.f32 %v342_v50, %v341_v43 }
 0x1d9   :  { %v351_v56 = vmul.f32 %v434_v47, %v336_v52 }
 0x1da   :  { %v352_v58 = vmul.f32 %v436_v51, %v343_v54 }
 0x1db   :  { %v354_v61 = vadd.f32 %v353_v53, %v351_v56 }
 0x1dc   :  { %v355_v63 = vadd.f32 %v353_v53, %v352_v58 }
 0x1dd   :  { %v358_v4 = vadd.f32 %v356_v55, %v354_v61 }
 0x1de   :  { %v359_v5 = vadd.f32 %v357_v57, %v355_v63 }
 0x1df   :  { %v360_v8 = vmul.f32 -0.5, %v358_v4 }
 0x1e0   :  { %v361_v9 = vmul.f32 -0.5, %v359_v5 }
 0x1e1   :  { %v368_v10 = vadd.f32 %v366_v7, %v360_v8 }
 0x1e2   :  { %v369_v11 = vadd.f32 %v367_v1, %v361_v9 }
 0x1e4   :  { %v372_v12 = vcombine.high %v368_v10, %v369_v11 }
 0x1e6   :  { %v379_v13 = vrot.slane %v372_v12, %v378_v0 }
 0x1e8   :  { %v380_v14 = vcombine.high %v379_v13, %v379_v13 }
 0x1ea   :  { %v387_v15 = vrot.slane %v380_v14, %v378_v0 }
 0x1ec   :  { %v388_v3 = vcombine.high %v387_v15, %v387_v15 }
 0x1ee   :  { %394 = vst.msk [vmem:[#allocation3] sm:$0x3] %vm392_vm2, %v388_v3 }
 0x1ef   :  { %448 = shalt.err (!%p445_p4)
}
 0x1f0   :  { %s449_s25 = scalar_lea.hbm %s593_s3, 32 }
 0x1f1   :  { %p450_p5 = scmp.ne.s32.totalorder %s593_s3, %s449_s25  ;;  %p453_p6 = scmp.lt.u32.totalorder %s449_s25, %s593_s3 }
 0x1f3   :  { %p455_p7 = pnand %p453_p6, %p450_p5 }
 0x1f5   :  { %458 = shalt.err (!%p455_p7)
}
 0x1f6   :  { %404 = dma.vmem_to_hbm [thread:$0]  %s402_s21, 32, %s593_s3, [#allocation4]  }
 0x1f7   :  { %459 = dma.done.wait [#allocation4], 32  }
 0x1f8   :  { %460 = vsyncadd [#allocation4], 4294967264 }
 0x1f9   :  { %408 = vsyncpa [#allocation4], 1 }

</bundles_post_ra>
